<compile_context>
chip_gen: v7x
topology: tpu7x:2x2x1
jax: 0.10.0
libtpu: 0.0.40
codegen_flags: <defaults>
</compile_context>

<pallas_src>
import functools

import numpy as np
import jax
import jax.numpy as jnp
from jax.experimental import pallas as pl
from jax.experimental.pallas import tpu as pltpu  # noqa: F401  (kept for TPU-specific tuning hooks)


# ----------------------------- Pallas kernel ------------------------------- #
def lightgcn_kernel(adj_ref, e0_ref, out_ref, *, n_layers):
    """Fused LightGCN propagation: out = mean(E_0, A E_0, ..., A^L E_0).

    adj_ref : [N, N] normalized adjacency (VMEM, f32)
    e0_ref  : [N, D] ego embeddings (VMEM, f32)
    out_ref : [N, D] mean over the (n_layers + 1) stacked embeddings
    """
    e = e0_ref[...]
    acc = e
    # Statically unrolled recurrence; e / acc stay in vregs.  adj is re-streamed
    # from VMEM per step (vld has slack; avoids a long adj live range / spills).
    for _ in range(n_layers):
        e = jnp.dot(adj_ref[...], e, preferred_element_type=jnp.float32)
        acc = acc + e
    out_ref[...] = (acc * (1.0 / (n_layers + 1.0))).astype(out_ref.dtype)


@functools.partial(jax.jit, static_argnames=("n_layers", "n_users"))
def lightgcn_forward(norm_adj, ego_emb, n_layers, n_users):
    """Runs the LightGCN propagation and returns (user_emb, item_emb)."""
    N, D = ego_emb.shape
    assert norm_adj.shape == (N, N)
    assert n_layers >= 0

    # Single-block residency check: adj (double-buffered) + E0 + out + acc/e working set.
    # Sized against the tightest scoped-VMEM default (v7x: 32 MiB).  Beyond this, switch
    # to a (row-parallel, K-reduction) tiled grid.
    # TODO(synk): large-N path — tile adj as (TM, TK) with K innermost ("arbitrary"),
    # a "parallel" row axis for v7x's second TensorCore, and bf16x2 adj.
    vmem_bytes = 4 * (2 * N * N + 4 * N * D)
    assert vmem_bytes <= 24 * 1024 * 1024, (
        f"N={N} exceeds single-block VMEM budget ({vmem_bytes} B); use the tiled path."
    )

    adj_f32 = norm_adj.astype(jnp.float32)
    ego_f32 = ego_emb.astype(jnp.float32)

    cost = pl.CostEstimate(
        flops=2 * n_layers * N * N * D,
        transcendentals=0,
        bytes_accessed=4 * (N * N + 2 * N * D),
    )

    out = pl.pallas_call(
        functools.partial(lightgcn_kernel, n_layers=n_layers),
        out_shape=jax.ShapeDtypeStruct((N, D), jnp.float32),
        in_specs=[
            pl.BlockSpec((N, N), lambda: (0, 0)),  # full adjacency resident
            pl.BlockSpec((N, D), lambda: (0, 0)),  # full ego embeddings (block == array)
        ],
        out_specs=pl.BlockSpec((N, D), lambda: (0, 0)),
        cost_estimate=cost,
    )(adj_f32, ego_f32)

    out = out.astype(ego_emb.dtype)
    return out[:n_users], out[n_users:]


# ------------------------- Parameter / graph setup -------------------------- #
def xavier_uniform(key, shape):
    # nn.Embedding weight shape (num, dim): fan_out=num, fan_in=dim (PyTorch convention)
    fan_out, fan_in = shape
    bound = float(np.sqrt(6.0 / (fan_in + fan_out)))
    return jax.random.uniform(key, shape, dtype=jnp.float32, minval=-bound, maxval=bound)


def build_norm_adj(key, n_users, n_items):
    """Dense D^{-1/2} A D^{-1/2} from a synthetic binary interaction matrix."""
    N = n_users + n_items
    inter = (jax.random.uniform(key, (n_users, n_items)) < 0.1).astype(jnp.float32)
    A = jnp.zeros((N, N), dtype=jnp.float32)
    A = A.at[:n_users, n_users:].set(inter)
    A = A.at[n_users:, :n_users].set(inter.T)
    deg = (A > 0).sum(axis=1).astype(jnp.float32) + 1e-7
    d_inv_sqrt = jnp.power(deg, -0.5)
    return (d_inv_sqrt[:, None] * A) * d_inv_sqrt[None, :]


def reference_forward(norm_adj, ego_emb, n_layers, n_users):
    e = ego_emb
    layers = [e]
    for _ in range(n_layers):
        e = norm_adj @ e
        layers.append(e)
    mean_e = jnp.mean(jnp.stack(layers, axis=1), axis=1)
    return mean_e[:n_users], mean_e[n_users:]


# ----------------------------------- Main ----------------------------------- #
if __name__ == "__main__":
    n_users, n_items = 48, 80          # N = 128
    embedding_size = 64
    n_layers = 3

    key = jax.random.PRNGKey(0)
    k_adj, k_user, k_item = jax.random.split(key, 3)

    norm_adj = build_norm_adj(k_adj, n_users, n_items)
    user_w = xavier_uniform(k_user, (n_users, embedding_size))
    item_w = xavier_uniform(k_item, (n_items, embedding_size))
    ego_emb = jnp.concatenate([user_w, item_w], axis=0)  # [N, D]

    user_e, item_e = lightgcn_forward(norm_adj, ego_emb, n_layers, n_users)
    jax.block_until_ready(user_e)
    jax.block_until_ready(item_e)

    ref_u, ref_i = reference_forward(norm_adj, ego_emb, n_layers, n_users)
    np.testing.assert_allclose(np.asarray(user_e), np.asarray(ref_u), rtol=1e-5, atol=1e-5)
    np.testing.assert_allclose(np.asarray(item_e), np.asarray(ref_i), rtol=1e-5, atol=1e-5)

    print("KERNEL_OK")
</pallas_src>

<mosaic_0001>
module attributes {stable_mosaic.version = 11 : i64} {
  func.func @lightgcn_kernel(%arg0: memref<128x128xf32, #tpu.memory_space<vmem>>, %arg1: memref<128x64xf32, #tpu.memory_space<vmem>>, %arg2: memref<128x64xf32, #tpu.memory_space<vmem>>) attributes {dimension_semantics = [], scalar_prefetch = 0 : i64, scratch_operands = 0 : i64, tpu.core_type = #tpu.core_type<tc>} {
    %c0 = arith.constant 0 : index
    %c0_0 = arith.constant 0 : index
    %0 = vector.load %arg1[%c0, %c0_0] : memref<128x64xf32, #tpu.memory_space<vmem>>, vector<128x64xf32>
    %c0_1 = arith.constant 0 : index
    %c0_2 = arith.constant 0 : index
    %1 = vector.load %arg0[%c0_1, %c0_2] : memref<128x128xf32, #tpu.memory_space<vmem>>, vector<128x128xf32>
    %cst = arith.constant dense<0.000000e+00> : vector<128x64xf32>
    %2 = tpu.matmul %1, %0, %cst {dimension_numbers = #tpu.dot_dimension_numbers<[1], [0], [0], [1], [0, 0, 1, 1], [], []>} : vector<128x128xf32>, vector<128x64xf32>, vector<128x64xf32> -> vector<128x64xf32>
    %3 = arith.addf %0, %2 : vector<128x64xf32>
    %c0_3 = arith.constant 0 : index
    %c0_4 = arith.constant 0 : index
    %4 = vector.load %arg0[%c0_3, %c0_4] : memref<128x128xf32, #tpu.memory_space<vmem>>, vector<128x128xf32>
    %cst_5 = arith.constant dense<0.000000e+00> : vector<128x64xf32>
    %5 = tpu.matmul %4, %2, %cst_5 {dimension_numbers = #tpu.dot_dimension_numbers<[1], [0], [0], [1], [0, 0, 1, 1], [], []>} : vector<128x128xf32>, vector<128x64xf32>, vector<128x64xf32> -> vector<128x64xf32>
    %6 = arith.addf %3, %5 : vector<128x64xf32>
    %c0_6 = arith.constant 0 : index
    %c0_7 = arith.constant 0 : index
    %7 = vector.load %arg0[%c0_6, %c0_7] : memref<128x128xf32, #tpu.memory_space<vmem>>, vector<128x128xf32>
    %cst_8 = arith.constant dense<0.000000e+00> : vector<128x64xf32>
    %8 = tpu.matmul %7, %5, %cst_8 {dimension_numbers = #tpu.dot_dimension_numbers<[1], [0], [0], [1], [0, 0, 1, 1], [], []>} : vector<128x128xf32>, vector<128x64xf32>, vector<128x64xf32> -> vector<128x64xf32>
    %9 = arith.addf %6, %8 : vector<128x64xf32>
    %cst_9 = arith.constant 2.500000e-01 : f32
    %10 = vector.broadcast %cst_9 : f32 to vector<128x64xf32>
    %11 = arith.mulf %9, %10 : vector<128x64xf32>
    %c0_10 = arith.constant 0 : index
    %c0_11 = arith.constant 0 : index
    %12 = vector.load %arg2[%c0_10, %c0_11] : memref<128x64xf32, #tpu.memory_space<vmem>>, vector<128x64xf32>
    tpu.vector_store %arg2[%c0_10, %c0_11], %11 {strides = array<i32>} : memref<128x64xf32, #tpu.memory_space<vmem>>, vector<128x64xf32>,
    return
  }
}

</mosaic_0001>

<bundles_post_ra>
// kernel: lightgcn_forward.1
= control target key start
LH: loop header
LB: loop body
LE: loop exit
PB: predicated region body
PF: predicated region fallthrough
CT: control target
= control target key end

     0   :  { %vm542_vm0 = vcmask 523264   ;;  %s1343_s1 = inlined_call_operand.vmem [shape: f32[128,64], index: 1, kind: input, shape index: {}]   ;;  %s1344_s0 = inlined_call_operand.vmem [shape: f32[128,128], index: 0, kind: input, shape index: {}]   ;;  %s1345_s2 = inlined_call_operand.vmem [shape: f32[128,64], index: 2, kind: output, shape index: {}]  }
   0x1   :  { %v957_v0 = vld [vmem:[%s1343_s1] sm:$0xff]  ;;  %v962_v1 = vld [vmem:[%s1343_s1 + $0x8] sm:$0xff]  ;;  %v967_v2 = vld [vmem:[%s1343_s1 + $0x10] sm:$0xff] }
   0x2   :  { %v827_v3 = vpack.c.bf16 %v962_v1, %v957_v0  ;;  %v974_v4 = vld [vmem:[%s1343_s1 + $0x18] sm:$0xff]  ;;  %v981_v6 = vld [vmem:[%s1343_s1 + $0x20] sm:$0xff]  ;;  %v986_v7 = vld [vmem:[%s1343_s1 + $0x28] sm:$0xff] }
   0x3   :  { %v831_v5 = vpack.c.bf16 %v974_v4, %v967_v2  ;;  %v835_v8 = vpack.c.bf16 %v986_v7, %v981_v6  ;;  %v27_v9 = vld [vmem:[%s1344_s0] sm:$0xff]  ;;  %v996_v10 = vld [vmem:[%s1343_s1 + $0x30] sm:$0xff]  ;;  %v1001_v11 = vld [vmem:[%s1343_s1 + $0x38] sm:$0xff] }
   0x4   :  { %828 = vmatprep.subr.bf16.mxu0 %v827_v3  ;;  %691 = vmatprep.mubr.f32.mxu0 %v27_v9  ;;  %v839_v12 = vpack.c.bf16 %v1001_v11, %v996_v10  ;;  %v1008_v13 = vld [vmem:[%s1343_s1 + $0x40] sm:$0xff]  ;;  %v1013_v14 = vld [vmem:[%s1343_s1 + $0x48] sm:$0xff]  ;;  %v1020_v16 = vld [vmem:[%s1343_s1 + $0x50] sm:$0xff] }
   0x5   :  { %830 = vmatpush3.bf16.msra.mxu0 %v827_v3  ;;  %747 = vmatprep.mubr.f32.mxu1 %v27_v9  ;;  %v843_v15 = vpack.c.bf16 %v1013_v14, %v1008_v13  ;;  %v1025_v17 = vld [vmem:[%s1343_s1 + $0x58] sm:$0xff]  ;;  %v1032_v19 = vld [vmem:[%s1343_s1 + $0x60] sm:$0xff]  ;;  %v1037_v20 = vld [vmem:[%s1343_s1 + $0x68] sm:$0xff] }
   0x6   :  { %832 = vmatprep.subr.bf16.mxu0 %v831_v5  ;;  %v847_v18 = vpack.c.bf16 %v1025_v17, %v1020_v16  ;;  %v851_v21 = vpack.c.bf16 %v1037_v20, %v1032_v19  ;;  %v1044_v22 = vld [vmem:[%s1343_s1 + $0x70] sm:$0xff]  ;;  %v1049_v23 = vld [vmem:[%s1343_s1 + $0x78] sm:$0xff]  ;;  %v1056_v25 = vld [vmem:[%s1344_s0 + $0x8] sm:$0xff] }
   0x7   :  { %v855_v24 = vpack.c.bf16 %v1049_v23, %v1044_v22  ;;  %v1061_v26 = vld [vmem:[%s1344_s0 + $0x10] sm:$0xff]  ;;  %v1068_v27 = vld [vmem:[%s1344_s0 + $0x18] sm:$0xff]  ;;  %v1073_v28 = vld [vmem:[%s1344_s0 + $0x20] sm:$0xff] }
   0x8   :  { %v1080_v29 = vld [vmem:[%s1344_s0 + $0x28] sm:$0xff]  ;;  %v1085_v30 = vld [vmem:[%s1344_s0 + $0x30] sm:$0xff]  ;;  %v1092_v31 = vld [vmem:[%s1344_s0 + $0x38] sm:$0xff] }
   0x9   :  { %834 = vmatpush3.bf16.msra.mxu0 %v831_v5  ;;  %v1097_v32 = vld [vmem:[%s1344_s0 + $0x40] sm:$0xff]  ;;  %v1104_v33 = vld [vmem:[%s1344_s0 + $0x48] sm:$0xff]  ;;  %v1109_v34 = vld [vmem:[%s1344_s0 + $0x50] sm:$0xff] }
   0xa   :  { %836 = vmatprep.subr.bf16.mxu0 %v835_v8  ;;  %v1116_v35 = vld [vmem:[%s1344_s0 + $0x58] sm:$0xff]  ;;  %v1121_v36 = vld [vmem:[%s1344_s0 + $0x60] sm:$0xff]  ;;  %v1128_v37 = vld [vmem:[%s1344_s0 + $0x68] sm:$0xff] }
   0xb   :  { %v1133_v38 = vld [vmem:[%s1344_s0 + $0x70] sm:$0xff]  ;;  %v1140_v39 = vld [vmem:[%s1344_s0 + $0x78] sm:$0xff] }
   0xd   :  { %838 = vmatpush3.bf16.msra.mxu0 %v835_v8 }
   0xe   :  { %840 = vmatprep.subr.bf16.mxu0 %v839_v12 }
  0x11   :  { %842 = vmatpush3.bf16.msra.mxu0 %v839_v12 }
  0x12   :  { %844 = vmatprep.subr.bf16.mxu0 %v843_v15 }
  0x15   :  { %846 = vmatpush3.bf16.msra.mxu0 %v843_v15 }
  0x16   :  { %848 = vmatprep.subr.bf16.mxu0 %v847_v18 }
  0x19   :  { %850 = vmatpush3.bf16.msra.mxu0 %v847_v18 }
  0x1a   :  { %852 = vmatprep.subr.bf16.mxu0 %v851_v21 }
  0x1d   :  { %854 = vmatpush3.bf16.msra.mxu0 %v851_v21 }
  0x1e   :  { %856 = vmatprep.subr.bf16.mxu0 %v855_v24 }
  0x21   :  { %858 = vmatpush3.bf16.msra.mxu0 %v855_v24 }
  0x24   :  { %692 = vmatmul.mubr.f32.vlgmr.msra.gmra.mrb[0].mxu0 %v1056_v25 }
  0x25   :  { %694 = vmatprep.mubr.f32.mxu0 %v1061_v26 }
  0x28   :  { %695 = vmatmul.mubr.f32.gmra.mrb[2].mxu0 %v1068_v27 }
  0x29   :  { %697 = vmatprep.mubr.f32.mxu0 %v1073_v28 }
  0x2c   :  { %698 = vmatmul.mubr.f32.gmra.mrb[4].mxu0 %v1080_v29 }
  0x2d   :  { %700 = vmatprep.mubr.f32.mxu0 %v1085_v30 }
  0x30   :  { %701 = vmatmul.mubr.f32.gmra.mrb[6].mxu0 %v1092_v31 }
  0x31   :  { %703 = vmatprep.mubr.f32.mxu0 %v1097_v32 }
  0x34   :  { %704 = vmatmul.mubr.f32.gmra.mrb[8].mxu0 %v1104_v33 }
  0x35   :  { %706 = vmatprep.mubr.f32.mxu0 %v1109_v34 }
  0x38   :  { %707 = vmatmul.mubr.f32.gmra.mrb[10].mxu0 %v1116_v35 }
  0x39   :  { %709 = vmatprep.mubr.f32.mxu0 %v1121_v36 }
  0x3c   :  { %710 = vmatmul.mubr.f32.gmra.mrb[12].mxu0 %v1128_v37 }
  0x3d   :  { %712 = vmatprep.mubr.f32.mxu0 %v1133_v38 }
  0x40   :  { %713 = vmatmul.mubr.f32.gmra.mrb[14].mxu0 %v1140_v39 }
  0x41   :  { %803 = vmatprep.mubr.f32.mxu0 %v27_v9 }
  0xf7   :  { %v693_v40 = vpop.f32.mrb[0].mxu0 }
  0xf8   :  { %v109_v41 = vpop.f32.mrb[1].mxu0  ;;  %v189_v3 = vadd.f32 %v693_v40, %v962_v1 }
  0xf9   :  { %v859_v42 = vpack.c.bf16 %v693_v40, %v109_v41  ;;  %v188_v5 = vadd.f32 %v109_v41, %v957_v0 }
  0xfb   :  { %v696_v43 = vpop.f32.mrb[2].mxu0  ;;  %860 = vmatprep.subr.bf16.mxu1 %v859_v42 }
  0xfc   :  { %v119_v44 = vpop.f32.mrb[3].mxu0  ;;  %862 = vmatpush3.bf16.msra.mxu1 %v859_v42  ;;  %v191_v21 = vadd.f32 %v696_v43, %v974_v4 }
  0xfd   :  { %v863_v45 = vpack.c.bf16 %v696_v43, %v119_v44  ;;  %v190_v24 = vadd.f32 %v119_v44, %v967_v2 }
  0xff   :  { %v1143_v46 = vpop.f32.mrb[4].mxu0  ;;  %864 = vmatprep.subr.bf16.mxu1 %v863_v45 }
 0x100   :  { %v1145_v47 = vpop.f32.mrb[5].mxu0  ;;  %866 = vmatpush3.bf16.msra.mxu1 %v863_v45  ;;  %v193_v40 = vadd.f32 %v1143_v46, %v986_v7 }
 0x101   :  { %v867_v48 = vpack.c.bf16 %v1143_v46, %v1145_v47  ;;  %v192_v41 = vadd.f32 %v1145_v47, %v981_v6 }
 0x103   :  { %v1149_v49 = vpop.f32.mrb[6].mxu0  ;;  %868 = vmatprep.subr.bf16.mxu1 %v867_v48 }
 0x104   :  { %v1151_v50 = vpop.f32.mrb[7].mxu0  ;;  %870 = vmatpush3.bf16.msra.mxu1 %v867_v48 }
 0x105   :  { %v871_v51 = vpack.c.bf16 %v1149_v49, %v1151_v50  ;;  %v194_v7 = vadd.f32 %v1151_v50, %v996_v10 }
 0x107   :  { %v1155_v52 = vpop.f32.mrb[8].mxu0  ;;  %872 = vmatprep.subr.bf16.mxu1 %v871_v51 }
 0x108   :  { %v1157_v53 = vpop.f32.mrb[9].mxu0  ;;  %874 = vmatpush3.bf16.msra.mxu1 %v871_v51  ;;  %v195_v51 = vadd.f32 %v1149_v49, %v1001_v11 }
 0x109   :  { %v875_v54 = vpack.c.bf16 %v1155_v52, %v1157_v53  ;;  %v196_v11 = vadd.f32 %v1157_v53, %v1008_v13 }
 0x10b   :  { %v1161_v55 = vpop.f32.mrb[10].mxu0  ;;  %876 = vmatprep.subr.bf16.mxu1 %v875_v54 }
 0x10c   :  { %v1163_v56 = vpop.f32.mrb[11].mxu0  ;;  %878 = vmatpush3.bf16.msra.mxu1 %v875_v54 }
 0x10d   :  { %v879_v57 = vpack.c.bf16 %v1161_v55, %v1163_v56 }
 0x10f   :  { %v1167_v58 = vpop.f32.mrb[12].mxu0  ;;  %880 = vmatprep.subr.bf16.mxu1 %v879_v57 }
 0x110   :  { %v1169_v59 = vpop.f32.mrb[13].mxu0  ;;  %882 = vmatpush3.bf16.msra.mxu1 %v879_v57 }
 0x111   :  { %v883_v60 = vpack.c.bf16 %v1167_v58, %v1169_v59 }
 0x113   :  { %v1173_v61 = vpop.f32.mrb[14].mxu0  ;;  %884 = vmatprep.subr.bf16.mxu1 %v883_v60 }
 0x114   :  { %v1175_v62 = vpop.f32.mrb[15].mxu0  ;;  %886 = vmatpush3.bf16.msra.mxu1 %v883_v60  ;;  %v197_v60 = vadd.f32 %v1155_v52, %v1013_v14 }
 0x115   :  { %v887_v63 = vpack.c.bf16 %v1173_v61, %v1175_v62 }
 0x117   :  { %888 = vmatprep.subr.bf16.mxu1 %v887_v63 }
 0x118   :  { %890 = vmatpush3.bf16.msra.mxu1 %v887_v63 }
 0x11b   :  { %748 = vmatmul.mubr.f32.vlgmr.msra.gmra.mrb[0].mxu1 %v1056_v25 }
 0x11c   :  { %750 = vmatprep.mubr.f32.mxu1 %v1061_v26 }
 0x11f   :  { %751 = vmatmul.mubr.f32.gmra.mrb[2].mxu1 %v1068_v27 }
 0x120   :  { %753 = vmatprep.mubr.f32.mxu1 %v1073_v28 }
 0x123   :  { %754 = vmatmul.mubr.f32.gmra.mrb[4].mxu1 %v1080_v29 }
 0x124   :  { %756 = vmatprep.mubr.f32.mxu1 %v1085_v30 }
 0x127   :  { %757 = vmatmul.mubr.f32.gmra.mrb[6].mxu1 %v1092_v31 }
 0x128   :  { %759 = vmatprep.mubr.f32.mxu1 %v1097_v32 }
 0x12b   :  { %760 = vmatmul.mubr.f32.gmra.mrb[8].mxu1 %v1104_v33 }
 0x12c   :  { %762 = vmatprep.mubr.f32.mxu1 %v1109_v34 }
 0x12f   :  { %763 = vmatmul.mubr.f32.gmra.mrb[10].mxu1 %v1116_v35 }
 0x130   :  { %765 = vmatprep.mubr.f32.mxu1 %v1121_v36 }
 0x133   :  { %766 = vmatmul.mubr.f32.gmra.mrb[12].mxu1 %v1128_v37 }
 0x134   :  { %768 = vmatprep.mubr.f32.mxu1 %v1133_v38 }
 0x137   :  { %769 = vmatmul.mubr.f32.gmra.mrb[14].mxu1 %v1140_v39 }
 0x138   :  { %815 = vmatprep.mubr.f32.mxu1 %v1097_v32 }
 0x1ee   :  { %v749_v8 = vpop.f32.mrb[0].mxu1 }
 0x1ef   :  { %v1197_v9 = vadd.f32 %v749_v8, %v189_v3  ;;  %v270_v12 = vpop.f32.mrb[1].mxu1 }
 0x1f0   :  { %v1199_v15 = vadd.f32 %v270_v12, %v188_v5  ;;  %v891_v18 = vpack.c.bf16 %v749_v8, %v270_v12  ;;  %v199_v5 = vadd.f32 %v1161_v55, %v1025_v17  ;;  %v198_v8 = vadd.f32 %v1163_v56, %v1020_v16 }
 0x1f1   :  { %v200_v17 = vadd.f32 %v1169_v59, %v1032_v19 }
 0x1f2   :  { %v752_v42 = vpop.f32.mrb[2].mxu1  ;;  %892 = vmatprep.subr.bf16.mxu0 %v891_v18  ;;  %923 = vmatprep.subr.bf16.mxu1 %v891_v18 }
 0x1f3   :  { %v1203_v45 = vadd.f32 %v752_v42, %v191_v21  ;;  %v280_v32 = vpop.f32.mrb[3].mxu1  ;;  %894 = vmatpush3.bf16.msra.mxu0 %v891_v18  ;;  %931 = vmatpush3.bf16.msra.mxu1 %v891_v18  ;;  %v201_v18 = vadd.f32 %v1167_v58, %v1037_v20  ;;  %v202_v20 = vadd.f32 %v1175_v62, %v1044_v22 }
 0x1f4   :  { %v1205_v0 = vadd.f32 %v280_v32, %v190_v24  ;;  %v895_v1 = vpack.c.bf16 %v752_v42, %v280_v32  ;;  %v203_v42 = vadd.f32 %v1173_v61, %v1049_v23 }
 0x1f6   :  { %v755_v4 = vpop.f32.mrb[4].mxu1  ;;  %896 = vmatprep.subr.bf16.mxu0 %v895_v1  ;;  %924 = vmatprep.subr.bf16.mxu1 %v895_v1 }
 0x1f7   :  { %v1211_v2 = vadd.f32 %v755_v4, %v193_v40  ;;  %v290_v43 = vpop.f32.mrb[5].mxu1  ;;  %898 = vmatpush3.bf16.msra.mxu0 %v895_v1  ;;  %932 = vmatpush3.bf16.msra.mxu1 %v895_v1 }
 0x1f8   :  { %v1213_v44 = vadd.f32 %v290_v43, %v192_v41  ;;  %v899_v48 = vpack.c.bf16 %v755_v4, %v290_v43 }
 0x1fa   :  { %v758_v46 = vpop.f32.mrb[6].mxu1  ;;  %900 = vmatprep.subr.bf16.mxu0 %v899_v48  ;;  %925 = vmatprep.subr.bf16.mxu1 %v899_v48 }
 0x1fb   :  { %v1219_v6 = vadd.f32 %v758_v46, %v195_v51  ;;  %v300_v47 = vpop.f32.mrb[7].mxu1  ;;  %902 = vmatpush3.bf16.msra.mxu0 %v899_v48  ;;  %933 = vmatpush3.bf16.msra.mxu1 %v899_v48 }
 0x1fc   :  { %v1221_v54 = vadd.f32 %v300_v47, %v194_v7  ;;  %v903_v57 = vpack.c.bf16 %v758_v46, %v300_v47 }
 0x1fe   :  { %v761_v49 = vpop.f32.mrb[8].mxu1  ;;  %904 = vmatprep.subr.bf16.mxu0 %v903_v57  ;;  %926 = vmatprep.subr.bf16.mxu1 %v903_v57 }
 0x1ff   :  { %v358_v10 = vadd.f32 %v761_v49, %v197_v60  ;;  %v310_v50 = vpop.f32.mrb[9].mxu1  ;;  %906 = vmatpush3.bf16.msra.mxu0 %v903_v57  ;;  %934 = vmatpush3.bf16.msra.mxu1 %v903_v57 }
 0x200   :  { %v357_v63 = vadd.f32 %v310_v50, %v196_v11  ;;  %v907_v3 = vpack.c.bf16 %v761_v49, %v310_v50 }
 0x202   :  { %v764_v12 = vpop.f32.mrb[10].mxu1  ;;  %908 = vmatprep.subr.bf16.mxu0 %v907_v3  ;;  %927 = vmatprep.subr.bf16.mxu1 %v907_v3 }
 0x203   :  { %v1231_v14 = vadd.f32 %v764_v12, %v199_v5  ;;  %v320_v13 = vpop.f32.mrb[11].mxu1  ;;  %910 = vmatpush3.bf16.msra.mxu0 %v907_v3  ;;  %935 = vmatpush3.bf16.msra.mxu1 %v907_v3 }
 0x204   :  { %v1233_v52 = vadd.f32 %v320_v13, %v198_v8  ;;  %v911_v53 = vpack.c.bf16 %v764_v12, %v320_v13 }
 0x206   :  { %v767_v55 = vpop.f32.mrb[12].mxu1  ;;  %912 = vmatprep.subr.bf16.mxu0 %v911_v53  ;;  %928 = vmatprep.subr.bf16.mxu1 %v911_v53 }
 0x207   :  { %v1239_v16 = vadd.f32 %v767_v55, %v201_v18  ;;  %v330_v56 = vpop.f32.mrb[13].mxu1  ;;  %914 = vmatpush3.bf16.msra.mxu0 %v911_v53  ;;  %936 = vmatpush3.bf16.msra.mxu1 %v911_v53 }
 0x208   :  { %v1241_v21 = vadd.f32 %v330_v56, %v200_v17  ;;  %v915_v24 = vpack.c.bf16 %v767_v55, %v330_v56 }
 0x20a   :  { %v770_v58 = vpop.f32.mrb[14].mxu1  ;;  %916 = vmatprep.subr.bf16.mxu0 %v915_v24  ;;  %929 = vmatprep.subr.bf16.mxu1 %v915_v24 }
 0x20b   :  { %v1247_v19 = vadd.f32 %v770_v58, %v203_v42  ;;  %v340_v59 = vpop.f32.mrb[15].mxu1  ;;  %918 = vmatpush3.bf16.msra.mxu0 %v915_v24  ;;  %937 = vmatpush3.bf16.msra.mxu1 %v915_v24 }
 0x20c   :  { %v1249_v32 = vadd.f32 %v340_v59, %v202_v20  ;;  %v919_v1 = vpack.c.bf16 %v770_v58, %v340_v59 }
 0x20e   :  { %920 = vmatprep.subr.bf16.mxu0 %v919_v1  ;;  %930 = vmatprep.subr.bf16.mxu1 %v919_v1 }
 0x20f   :  { %922 = vmatpush3.bf16.msra.mxu0 %v919_v1  ;;  %938 = vmatpush3.bf16.msra.mxu1 %v919_v1 }
 0x212   :  { %804 = vmatmul.mubr.f32.vlgmr.msra.gmra.mrb[16].mxu0 %v1056_v25  ;;  %816 = vmatmul.mubr.f32.vlgmr.msra.gmra.mrb[16].mxu1 %v1104_v33 }
 0x213   :  { %806 = vmatprep.mubr.f32.mxu0 %v1061_v26  ;;  %818 = vmatprep.mubr.f32.mxu1 %v1109_v34 }
 0x216   :  { %807 = vmatmul.mubr.f32.gmra.mrb[18].mxu0 %v1068_v27  ;;  %819 = vmatmul.mubr.f32.gmra.mrb[18].mxu1 %v1116_v35 }
 0x217   :  { %809 = vmatprep.mubr.f32.mxu0 %v1073_v28  ;;  %821 = vmatprep.mubr.f32.mxu1 %v1121_v36 }
 0x21a   :  { %810 = vmatmul.mubr.f32.gmra.mrb[20].mxu0 %v1080_v29  ;;  %822 = vmatmul.mubr.f32.gmra.mrb[20].mxu1 %v1128_v37 }
 0x21b   :  { %812 = vmatprep.mubr.f32.mxu0 %v1085_v30  ;;  %824 = vmatprep.mubr.f32.mxu1 %v1133_v38 }
 0x21e   :  { %813 = vmatmul.mubr.f32.gmra.mrb[22].mxu0 %v1092_v31  ;;  %825 = vmatmul.mubr.f32.gmra.mrb[22].mxu1 %v1140_v39 }
 0x2e5   :  { %v805_v22 = vpop.f32.mrb[16].mxu0  ;;  %v817_v23 = vpop.f32.mrb[16].mxu1 }
 0x2e6   :  { %v511_v25 = vadd.f32 %v805_v22, %v1197_v9  ;;  %v519_v26 = vadd.f32 %v817_v23, %v358_v10  ;;  %v431_v27 = vpop.f32.mrb[17].mxu0  ;;  %v471_v28 = vpop.f32.mrb[17].mxu1 }
 0x2e7   :  { %v510_v29 = vadd.f32 %v431_v27, %v1199_v15  ;;  %v518_v33 = vadd.f32 %v471_v28, %v357_v63 }
 0x2e8   :  { %v527_v34 = vmul.f32 0.25, %v511_v25  ;;  %v535_v35 = vmul.f32 0.25, %v519_v26 }
 0x2e9   :  { %v526_v30 = vmul.f32 0.25, %v510_v29  ;;  %v534_v36 = vmul.f32 0.25, %v518_v33  ;;  %v808_v37 = vpop.f32.mrb[18].mxu0  ;;  %v820_v38 = vpop.f32.mrb[18].mxu1 }
 0x2ea   :  { %544 = vst.msk [vmem:[%s1345_s2 + $0x8] sm:$0xff] %vm542_vm0, %v527_v34  ;;  %552 = vst.msk [vmem:[%s1345_s2 + $0x48] sm:$0xff] %vm542_vm0, %v535_v35  ;;  %v513_v31 = vadd.f32 %v808_v37, %v1203_v45  ;;  %v521_v39 = vadd.f32 %v820_v38, %v1231_v14  ;;  %v441_v61 = vpop.f32.mrb[19].mxu0  ;;  %v481_v62 = vpop.f32.mrb[19].mxu1 }
 0x2eb   :  { %543 = vst.msk [vmem:[%s1345_s2] sm:$0xff] %vm542_vm0, %v526_v30  ;;  %551 = vst.msk [vmem:[%s1345_s2 + $0x40] sm:$0xff] %vm542_vm0, %v534_v36  ;;  %v512_v9 = vadd.f32 %v441_v61, %v1205_v0  ;;  %v520_v15 = vadd.f32 %v481_v62, %v1233_v52 }
 0x2ec   :  { %v529_v40 = vmul.f32 0.25, %v513_v31  ;;  %v537_v45 = vmul.f32 0.25, %v521_v39 }
 0x2ed   :  { %v528_v41 = vmul.f32 0.25, %v512_v9  ;;  %v536_v4 = vmul.f32 0.25, %v520_v15  ;;  %v811_v43 = vpop.f32.mrb[20].mxu0  ;;  %v823_v48 = vpop.f32.mrb[20].mxu1 }
 0x2ee   :  { %546 = vst.msk [vmem:[%s1345_s2 + $0x18] sm:$0xff] %vm542_vm0, %v529_v40  ;;  %554 = vst.msk [vmem:[%s1345_s2 + $0x58] sm:$0xff] %vm542_vm0, %v537_v45  ;;  %v515_v0 = vadd.f32 %v811_v43, %v1211_v2  ;;  %v523_v51 = vadd.f32 %v823_v48, %v1239_v16  ;;  %v451_v7 = vpop.f32.mrb[21].mxu0  ;;  %v491_v46 = vpop.f32.mrb[21].mxu1 }
 0x2ef   :  { %545 = vst.msk [vmem:[%s1345_s2 + $0x10] sm:$0xff] %vm542_vm0, %v528_v41  ;;  %553 = vst.msk [vmem:[%s1345_s2 + $0x50] sm:$0xff] %vm542_vm0, %v536_v4  ;;  %v514_v47 = vadd.f32 %v451_v7, %v1213_v44  ;;  %v522_v57 = vadd.f32 %v491_v46, %v1241_v21 }
 0x2f0   :  { %v531_v60 = vmul.f32 0.25, %v515_v0  ;;  %v539_v2 = vmul.f32 0.25, %v523_v51 }
 0x2f1   :  { %v530_v11 = vmul.f32 0.25, %v514_v47  ;;  %v538_v49 = vmul.f32 0.25, %v522_v57  ;;  %v814_v10 = vpop.f32.mrb[22].mxu0  ;;  %v826_v50 = vpop.f32.mrb[22].mxu1 }
 0x2f2   :  { %548 = vst.msk [vmem:[%s1345_s2 + $0x28] sm:$0xff] %vm542_vm0, %v531_v60  ;;  %556 = vst.msk [vmem:[%s1345_s2 + $0x68] sm:$0xff] %vm542_vm0, %v539_v2  ;;  %v517_v44 = vadd.f32 %v814_v10, %v1219_v6  ;;  %v525_v63 = vadd.f32 %v826_v50, %v1247_v19  ;;  %v461_v3 = vpop.f32.mrb[23].mxu0  ;;  %v501_v5 = vpop.f32.mrb[23].mxu1 }
 0x2f3   :  { %547 = vst.msk [vmem:[%s1345_s2 + $0x20] sm:$0xff] %vm542_vm0, %v530_v11  ;;  %555 = vst.msk [vmem:[%s1345_s2 + $0x60] sm:$0xff] %vm542_vm0, %v538_v49  ;;  %v516_v8 = vadd.f32 %v461_v3, %v1221_v54  ;;  %v524_v12 = vadd.f32 %v501_v5, %v1249_v32 }
 0x2f4   :  { %v533_v14 = vmul.f32 0.25, %v517_v44  ;;  %v541_v6 = vmul.f32 0.25, %v525_v63 }
 0x2f5   :  { %v532_v13 = vmul.f32 0.25, %v516_v8  ;;  %v540_v52 = vmul.f32 0.25, %v524_v12 }
 0x2f6   :  { %550 = vst.msk [vmem:[%s1345_s2 + $0x38] sm:$0xff] %vm542_vm0, %v533_v14  ;;  %558 = vst.msk [vmem:[%s1345_s2 + $0x78] sm:$0xff] %vm542_vm0, %v541_v6 }
 0x2f7   :  { %549 = vst.msk [vmem:[%s1345_s2 + $0x30] sm:$0xff] %vm542_vm0, %v532_v13  ;;  %557 = vst.msk [vmem:[%s1345_s2 + $0x70] sm:$0xff] %vm542_vm0, %v540_v52 }

</bundles_post_ra>
